<compile_context>
chip_gen: v5e
topology: v5e:2x2
jax: 0.10.0
libtpu: 0.0.40
codegen_flags: <defaults>
</compile_context>

<pallas_src>
from functools import partial

import jax
import jax.numpy as jnp
from jax.experimental import pallas as pl
from jax.experimental.pallas import tpu as pltpu


def _make_gru_fc_kernel(return_hidden):
    """Build the kernel; with/without the final-hidden-state output."""

    def kernel(x_ref, h0_ref, p_ref, *refs):
        if return_hidden:
            out_ref, hN_ref, h_scr = refs
        else:
            out_ref, h_scr = refs
            hN_ref = None

        TB, I = x_ref.shape              # x is time-major flattened: (T*B, I)
        B, H = h0_ref.shape
        T = TB // B
        O = out_ref.shape[1]
        H2, H3 = 2 * H, 3 * H
        f32 = jnp.float32

        # ---- unpack the single packed parameter operand (static slices) ----
        r0 = 0
        r1 = r0 + I                      # w_ih rows
        r2 = r1 + H                      # w_hh rows
        r3 = r2 + 1                      # folded gi-bias row
        r4 = r3 + 1                      # gh-bias row (only n lanes nonzero)
        r5 = r4 + H                      # w_fc rows
        w_ih = p_ref[r0:r1, :]           # (I, 3H)   gate order r|z|n
        w_hh = p_ref[r1:r2, :]           # (H, 3H)
        b_gi = p_ref[r2:r3, :]           # (1, 3H)   [b_ih_rz+b_hh_rz | b_ih_n]
        b_gh = p_ref[r3:r4, :]           # (1, 3H)   [0 | 0 | b_hh_n]
        w_fc = p_ref[r4:r5, 0:O]         # (H, O)
        b_fc = p_ref[r5:r5 + 1, 0:O]     # (1, O)

        # ---- hoisted, fused input projection: one matmul for all B*T ----
        gi = jnp.dot(x_ref[...], w_ih, preferred_element_type=f32) + b_gi  # (T*B, 3H)

        # ---- recurrence: batched over B in sublanes, one dot per step ----
        h = h0_ref[...]                  # (B, H)
        for t in range(T):               # fully unrolled (T static)
            gi_t = gi[t * B:(t + 1) * B, :]                               # (B, 3H)
            gh = jnp.dot(h, w_hh, preferred_element_type=f32) + b_gh      # (B, 3H)
            rz = jax.nn.sigmoid(gi_t[:, 0:H2] + gh[:, 0:H2])              # fused r|z
            r = rz[:, 0:H]
            z = rz[:, H:H2]
            n = jnp.tanh(gi_t[:, H2:H3] + r * gh[:, H2:H3])
            h = n + z * (h - n)          # == (1 - z) * n + z * h
            h_scr[t * B:(t + 1) * B, :] = h                               # (B,H) tile store

        if return_hidden:
            hN_ref[...] = h

        # ---- hoisted FC head: one matmul over every hidden state ----
        out_ref[...] = jnp.dot(h_scr[...], w_fc, preferred_element_type=f32) + b_fc

    return kernel


def init_params(key, input_size=4, hidden_size=8, output_size=4):
    """PyTorch-style uniform(-1/sqrt(H), 1/sqrt(H)) init. Gate order: r, z, n."""
    ks = jax.random.split(key, 6)
    k = 1.0 / jnp.sqrt(hidden_size)
    return {
        # already transposed for right-multiplication: (I, 3H), (H, 3H)
        "w_ih": jax.random.uniform(ks[0], (input_size, 3 * hidden_size),
                                   jnp.float32, -k, k),
        "w_hh": jax.random.uniform(ks[1], (hidden_size, 3 * hidden_size),
                                   jnp.float32, -k, k),
        "b_ih": jax.random.uniform(ks[2], (1, 3 * hidden_size),
                                   jnp.float32, -k, k),
        "b_hh": jax.random.uniform(ks[3], (1, 3 * hidden_size),
                                   jnp.float32, -k, k),
        "w_fc": jax.random.uniform(ks[4], (hidden_size, output_size),
                                   jnp.float32, -k, k),
        "b_fc": jax.random.uniform(ks[5], (1, output_size),
                                   jnp.float32, -k, k),
    }


def pack_params(params):
    """Fold biases & pack ALL 6 parameter arrays into ONE kernel operand.

    Layout (width = 3H, gate order r|z|n):
      rows [0, I)        w_ih (I, 3H)
      rows [I, I+H)      w_hh (H, 3H)
      row  I+H           folded gi bias: [b_ih_rz + b_hh_rz | b_ih_n]
      row  I+H+1         gh bias:        [0 | 0 | b_hh_n]   (added post-dot)
      rows [.., +H)      w_fc (H, O)  in cols [0, O)
      row  ..            b_fc (1, O)  in cols [0, O)
    Returns (packed_array, H, O).
    """
    w_ih, w_hh = params["w_ih"], params["w_hh"]
    b_ih, b_hh = params["b_ih"], params["b_hh"]
    w_fc, b_fc = params["w_fc"], params["b_fc"]
    I = w_ih.shape[0]
    H = w_hh.shape[0]
    O = w_fc.shape[1]
    H2, H3 = 2 * H, 3 * H
    width = max(H3, O)

    r0 = 0
    r1, r2 = r0 + I, r0 + I + H
    r3 = r2 + 1
    r4 = r3 + 1
    r5 = r4 + H
    rows = r5 + 1                                   # = I + 2H + 3

    p = jnp.zeros((rows, width), jnp.float32)
    p = p.at[r0:r1, 0:H3].set(w_ih)
    p = p.at[r1:r2, 0:H3].set(w_hh)
    p = p.at[r2, 0:H2].set(b_ih[0, 0:H2] + b_hh[0, 0:H2])   # r,z biases folded
    p = p.at[r2, H2:H3].set(b_ih[0, H2:H3])                  # b_ih_n
    p = p.at[r3, H2:H3].set(b_hh[0, H2:H3])                  # b_hh_n (scaled by r)
    p = p.at[r4:r5, 0:O].set(w_fc)
    p = p.at[r5, 0:O].set(b_fc[0])
    return p, H, O


@partial(jax.jit, static_argnames=("hidden_size", "output_size", "return_hidden"))
def _forward_jit(x, p, h0, *, hidden_size, output_size, return_hidden):
    B, T, I = x.shape
    H, O = hidden_size, output_size

    # Time-major flatten so gi[t*B:(t+1)*B] is contiguous inside the kernel.
    x_tm = jnp.transpose(x, (1, 0, 2)).reshape(T * B, I)

    vmem = pl.BlockSpec(memory_space=pltpu.MemorySpace.VMEM)
    out_shapes = [jax.ShapeDtypeStruct((T * B, O), jnp.float32)]
    if return_hidden:
        out_shapes.append(jax.ShapeDtypeStruct((B, H), jnp.float32))

    res = pl.pallas_call(
        _make_gru_fc_kernel(return_hidden),
        out_shape=tuple(out_shapes),
        in_specs=[vmem, vmem, vmem],
        out_specs=tuple([vmem] * len(out_shapes)),
        scratch_shapes=[pltpu.VMEM((T * B, H), jnp.float32)],
    )(x_tm, h0, p)

    out = jnp.transpose(res[0].reshape(T, B, O), (1, 0, 2))   # back to batch-first
    if return_hidden:
        return out, res[1][None]                              # hidden: (1, B, H)
    return out


def celegans_forward(x, packed, hidden_states=None):
    """x: (B, T, I) float32 (batch_first, like the PyTorch module).

    Returns out (B, T, O); if hidden_states (shape (1, B, H)) is given,
    returns (out, hidden) with hidden of shape (1, B, H).
    """
    p, H, O = packed
    B, T, I = x.shape
    return_hidden = hidden_states is not None
    if hidden_states is None:
        h0 = jnp.zeros((B, H), jnp.float32)
    else:
        h0 = hidden_states.reshape(B, H).astype(jnp.float32)
    return _forward_jit(x.astype(jnp.float32), p, h0,
                        hidden_size=H, output_size=O,
                        return_hidden=return_hidden)


def _reference_forward(x, params, hidden_states=None):
    """Pure-JAX reference (same math as PyTorch GRU + Linear, via lax.scan)."""
    B, T, I = x.shape
    H = params["w_hh"].shape[0]
    h0 = (jnp.zeros((B, H), jnp.float32) if hidden_states is None
          else hidden_states.reshape(B, H))

    def step(h, x_t):
        gi = x_t @ params["w_ih"] + params["b_ih"]
        gh = h @ params["w_hh"] + params["b_hh"]
        r = jax.nn.sigmoid(gi[:, :H] + gh[:, :H])
        z = jax.nn.sigmoid(gi[:, H:2 * H] + gh[:, H:2 * H])
        n = jnp.tanh(gi[:, 2 * H:] + r * gh[:, 2 * H:])
        h_new = (1.0 - z) * n + z * h
        return h_new, h_new

    hN, hs = jax.lax.scan(step, h0, jnp.transpose(x, (1, 0, 2)))
    out = jnp.einsum("tbh,ho->tbo", hs, params["w_fc"]) + params["b_fc"]
    out = jnp.transpose(out, (1, 0, 2))
    if hidden_states is None:
        return out
    return out, hN[None]


if __name__ == "__main__":
    B, T, I, H, O = 2, 8, 4, 8, 4
    key = jax.random.PRNGKey(0)
    k_x, k_p, k_h = jax.random.split(key, 3)

    x = jax.random.normal(k_x, (B, T, I), jnp.float32)
    params = init_params(k_p, input_size=I, hidden_size=H, output_size=O)
    packed = pack_params(params)                   # pack once, reused every call

    # Default path: hidden_states=None -> returns out only (no hN output DMA)
    out = celegans_forward(x, packed)
    out = jax.block_until_ready(out)
    ref = _reference_forward(x, params)
    assert out.shape == (B, T, O)
    assert jnp.allclose(out, ref, atol=1e-4, rtol=1e-4)

    # Path with explicit hidden state -> returns (out, hidden)
    h0 = jax.random.normal(k_h, (1, B, H), jnp.float32)
    out2, hN = celegans_forward(x, packed, hidden_states=h0)
    out2, hN = jax.block_until_ready((out2, hN))
    ref2, ref_hN = _reference_forward(x, params, hidden_states=h0)
    assert out2.shape == (B, T, O) and hN.shape == (1, B, H)
    assert jnp.allclose(out2, ref2, atol=1e-4, rtol=1e-4)
    assert jnp.allclose(hN, ref_hN, atol=1e-4, rtol=1e-4)

    print("KERNEL_OK")
</pallas_src>

<mosaic_0001>
module attributes {stable_mosaic.version = 11 : i64} {
  func.func @kernel(%arg0: memref<16x4xf32, #tpu.memory_space<vmem>>, %arg1: memref<2x8xf32, #tpu.memory_space<vmem>>, %arg2: memref<23x24xf32, #tpu.memory_space<vmem>>, %arg3: memref<16x4xf32, #tpu.memory_space<vmem>>, %arg4: memref<16x8xf32, #tpu.memory_space<vmem>>) attributes {dimension_semantics = [], scalar_prefetch = 0 : i64, scratch_operands = 1 : i64, tpu.core_type = #tpu.core_type<tc>} {
    %c0 = arith.constant 0 : index
    %c0_0 = arith.constant 0 : index
    %0 = vector.load %arg2[%c0, %c0_0] : memref<23x24xf32, #tpu.memory_space<vmem>>, vector<4x24xf32>
    %c4 = arith.constant 4 : index
    %c0_1 = arith.constant 0 : index
    %1 = vector.load %arg2[%c4, %c0_1] : memref<23x24xf32, #tpu.memory_space<vmem>>, vector<8x24xf32>
    %c12 = arith.constant 12 : index
    %c0_2 = arith.constant 0 : index
    %2 = vector.load %arg2[%c12, %c0_2] : memref<23x24xf32, #tpu.memory_space<vmem>>, vector<1x24xf32>
    %c13 = arith.constant 13 : index
    %c0_3 = arith.constant 0 : index
    %3 = vector.load %arg2[%c13, %c0_3] : memref<23x24xf32, #tpu.memory_space<vmem>>, vector<1x24xf32>
    %c14 = arith.constant 14 : index
    %c0_4 = arith.constant 0 : index
    %4 = vector.load %arg2[%c14, %c0_4] : memref<23x24xf32, #tpu.memory_space<vmem>>, vector<8x4xf32>
    %c22 = arith.constant 22 : index
    %c0_5 = arith.constant 0 : index
    %5 = vector.load %arg2[%c22, %c0_5] : memref<23x24xf32, #tpu.memory_space<vmem>>, vector<1x4xf32>
    %c0_6 = arith.constant 0 : index
    %c0_7 = arith.constant 0 : index
    %6 = vector.load %arg0[%c0_6, %c0_7] : memref<16x4xf32, #tpu.memory_space<vmem>>, vector<16x4xf32>
    %cst = arith.constant dense<0.000000e+00> : vector<16x24xf32>
    %7 = tpu.matmul %6, %0, %cst {dimension_numbers = #tpu.dot_dimension_numbers<[1], [0], [0], [1], [0, 0, 1, 1], [], []>} : vector<16x4xf32>, vector<4x24xf32>, vector<16x24xf32> -> vector<16x24xf32>
    %8 = vector.broadcast %2 : vector<1x24xf32> to vector<16x24xf32>
    %9 = arith.addf %7, %8 : vector<16x24xf32>
    %c0_8 = arith.constant 0 : index
    %c0_9 = arith.constant 0 : index
    %10 = vector.load %arg1[%c0_8, %c0_9] : memref<2x8xf32, #tpu.memory_space<vmem>>, vector<2x8xf32>
    %11 = vector.extract_strided_slice %9 {offsets = [0, 0], sizes = [2, 24], strides = [1, 1]} : vector<16x24xf32> to vector<2x24xf32>
    %cst_10 = arith.constant dense<0.000000e+00> : vector<2x24xf32>
    %12 = tpu.matmul %10, %1, %cst_10 {dimension_numbers = #tpu.dot_dimension_numbers<[1], [0], [0], [1], [0, 0, 1, 1], [], []>} : vector<2x8xf32>, vector<8x24xf32>, vector<2x24xf32> -> vector<2x24xf32>
    %13 = vector.broadcast %3 : vector<1x24xf32> to vector<2x24xf32>
    %14 = arith.addf %12, %13 : vector<2x24xf32>
    %15 = vector.extract_strided_slice %11 {offsets = [0, 0], sizes = [2, 16], strides = [1, 1]} : vector<2x24xf32> to vector<2x16xf32>
    %16 = vector.extract_strided_slice %14 {offsets = [0, 0], sizes = [2, 16], strides = [1, 1]} : vector<2x24xf32> to vector<2x16xf32>
    %17 = arith.addf %15, %16 : vector<2x16xf32>
    %18 = arith.negf %17 : vector<2x16xf32>
    %19 = math.exp %18 : vector<2x16xf32>
    %cst_11 = arith.constant 1.000000e+00 : f32
    %20 = vector.broadcast %cst_11 : f32 to vector<2x16xf32>
    %21 = arith.addf %20, %19 : vector<2x16xf32>
    %22 = arith.divf %20, %21 : vector<2x16xf32>
    %23 = vector.extract_strided_slice %22 {offsets = [0, 0], sizes = [2, 8], strides = [1, 1]} : vector<2x16xf32> to vector<2x8xf32>
    %24 = vector.extract_strided_slice %22 {offsets = [0, 8], sizes = [2, 8], strides = [1, 1]} : vector<2x16xf32> to vector<2x8xf32>
    %25 = vector.extract_strided_slice %11 {offsets = [0, 16], sizes = [2, 8], strides = [1, 1]} : vector<2x24xf32> to vector<2x8xf32>
    %26 = vector.extract_strided_slice %14 {offsets = [0, 16], sizes = [2, 8], strides = [1, 1]} : vector<2x24xf32> to vector<2x8xf32>
    %27 = arith.mulf %23, %26 : vector<2x8xf32>
    %28 = arith.addf %25, %27 : vector<2x8xf32>
    %29 = math.tanh %28 : vector<2x8xf32>
    %30 = arith.subf %10, %29 : vector<2x8xf32>
    %31 = arith.mulf %24, %30 : vector<2x8xf32>
    %32 = arith.addf %29, %31 : vector<2x8xf32>
    %c0_12 = arith.constant 0 : index
    %c0_13 = arith.constant 0 : index
    %33 = vector.load %arg4[%c0_12, %c0_13] : memref<16x8xf32, #tpu.memory_space<vmem>>, vector<2x8xf32>
    tpu.vector_store %arg4[%c0_12, %c0_13], %32 {strides = array<i32>} : memref<16x8xf32, #tpu.memory_space<vmem>>, vector<2x8xf32>,
    %34 = vector.extract_strided_slice %9 {offsets = [2, 0], sizes = [2, 24], strides = [1, 1]} : vector<16x24xf32> to vector<2x24xf32>
    %cst_14 = arith.constant dense<0.000000e+00> : vector<2x24xf32>
    %35 = tpu.matmul %32, %1, %cst_14 {dimension_numbers = #tpu.dot_dimension_numbers<[1], [0], [0], [1], [0, 0, 1, 1], [], []>} : vector<2x8xf32>, vector<8x24xf32>, vector<2x24xf32> -> vector<2x24xf32>
    %36 = vector.broadcast %3 : vector<1x24xf32> to vector<2x24xf32>
    %37 = arith.addf %35, %36 : vector<2x24xf32>
    %38 = vector.extract_strided_slice %34 {offsets = [0, 0], sizes = [2, 16], strides = [1, 1]} : vector<2x24xf32> to vector<2x16xf32>
    %39 = vector.extract_strided_slice %37 {offsets = [0, 0], sizes = [2, 16], strides = [1, 1]} : vector<2x24xf32> to vector<2x16xf32>
    %40 = arith.addf %38, %39 : vector<2x16xf32>
    %41 = arith.negf %40 : vector<2x16xf32>
    %42 = math.exp %41 : vector<2x16xf32>
    %cst_15 = arith.constant 1.000000e+00 : f32
    %43 = vector.broadcast %cst_15 : f32 to vector<2x16xf32>
    %44 = arith.addf %43, %42 : vector<2x16xf32>
    %45 = arith.divf %43, %44 : vector<2x16xf32>
    %46 = vector.extract_strided_slice %45 {offsets = [0, 0], sizes = [2, 8], strides = [1, 1]} : vector<2x16xf32> to vector<2x8xf32>
    %47 = vector.extract_strided_slice %45 {offsets = [0, 8], sizes = [2, 8], strides = [1, 1]} : vector<2x16xf32> to vector<2x8xf32>
    %48 = vector.extract_strided_slice %34 {offsets = [0, 16], sizes = [2, 8], strides = [1, 1]} : vector<2x24xf32> to vector<2x8xf32>
    %49 = vector.extract_strided_slice %37 {offsets = [0, 16], sizes = [2, 8], strides = [1, 1]} : vector<2x24xf32> to vector<2x8xf32>
    %50 = arith.mulf %46, %49 : vector<2x8xf32>
    %51 = arith.addf %48, %50 : vector<2x8xf32>
    %52 = math.tanh %51 : vector<2x8xf32>
    %53 = arith.subf %32, %52 : vector<2x8xf32>
    %54 = arith.mulf %47, %53 : vector<2x8xf32>
    %55 = arith.addf %52, %54 : vector<2x8xf32>
    %c2 = arith.constant 2 : index
    %c0_16 = arith.constant 0 : index
    %56 = vector.load %arg4[%c2, %c0_16] : memref<16x8xf32, #tpu.memory_space<vmem>>, vector<2x8xf32>
    tpu.vector_store %arg4[%c2, %c0_16], %55 {strides = array<i32>} : memref<16x8xf32, #tpu.memory_space<vmem>>, vector<2x8xf32>,
    %57 = vector.extract_strided_slice %9 {offsets = [4, 0], sizes = [2, 24], strides = [1, 1]} : vector<16x24xf32> to vector<2x24xf32>
    %cst_17 = arith.constant dense<0.000000e+00> : vector<2x24xf32>
    %58 = tpu.matmul %55, %1, %cst_17 {dimension_numbers = #tpu.dot_dimension_numbers<[1], [0], [0], [1], [0, 0, 1, 1], [], []>} : vector<2x8xf32>, vector<8x24xf32>, vector<2x24xf32> -> vector<2x24xf32>
    %59 = vector.broadcast %3 : vector<1x24xf32> to vector<2x24xf32>
    %60 = arith.addf %58, %59 : vector<2x24xf32>
    %61 = vector.extract_strided_slice %57 {offsets = [0, 0], sizes = [2, 16], strides = [1, 1]} : vector<2x24xf32> to vector<2x16xf32>
    %62 = vector.extract_strided_slice %60 {offsets = [0, 0], sizes = [2, 16], strides = [1, 1]} : vector<2x24xf32> to vector<2x16xf32>
    %63 = arith.addf %61, %62 : vector<2x16xf32>
    %64 = arith.negf %63 : vector<2x16xf32>
    %65 = math.exp %64 : vector<2x16xf32>
    %cst_18 = arith.constant 1.000000e+00 : f32
    %66 = vector.broadcast %cst_18 : f32 to vector<2x16xf32>
    %67 = arith.addf %66, %65 : vector<2x16xf32>
    %68 = arith.divf %66, %67 : vector<2x16xf32>
    %69 = vector.extract_strided_slice %68 {offsets = [0, 0], sizes = [2, 8], strides = [1, 1]} : vector<2x16xf32> to vector<2x8xf32>
    %70 = vector.extract_strided_slice %68 {offsets = [0, 8], sizes = [2, 8], strides = [1, 1]} : vector<2x16xf32> to vector<2x8xf32>
    %71 = vector.extract_strided_slice %57 {offsets = [0, 16], sizes = [2, 8], strides = [1, 1]} : vector<2x24xf32> to vector<2x8xf32>
    %72 = vector.extract_strided_slice %60 {offsets = [0, 16], sizes = [2, 8], strides = [1, 1]} : vector<2x24xf32> to vector<2x8xf32>
    %73 = arith.mulf %69, %72 : vector<2x8xf32>
    %74 = arith.addf %71, %73 : vector<2x8xf32>
    %75 = math.tanh %74 : vector<2x8xf32>
    %76 = arith.subf %55, %75 : vector<2x8xf32>
    %77 = arith.mulf %70, %76 : vector<2x8xf32>
    %78 = arith.addf %75, %77 : vector<2x8xf32>
    %c4_19 = arith.constant 4 : index
    %c0_20 = arith.constant 0 : index
    %79 = vector.load %arg4[%c4_19, %c0_20] : memref<16x8xf32, #tpu.memory_space<vmem>>, vector<2x8xf32>
    tpu.vector_store %arg4[%c4_19, %c0_20], %78 {strides = array<i32>} : memref<16x8xf32, #tpu.memory_space<vmem>>, vector<2x8xf32>,
    %80 = vector.extract_strided_slice %9 {offsets = [6, 0], sizes = [2, 24], strides = [1, 1]} : vector<16x24xf32> to vector<2x24xf32>
    %cst_21 = arith.constant dense<0.000000e+00> : vector<2x24xf32>
    %81 = tpu.matmul %78, %1, %cst_21 {dimension_numbers = #tpu.dot_dimension_numbers<[1], [0], [0], [1], [0, 0, 1, 1], [], []>} : vector<2x8xf32>, vector<8x24xf32>, vector<2x24xf32> -> vector<2x24xf32>
    %82 = vector.broadcast %3 : vector<1x24xf32> to vector<2x24xf32>
    %83 = arith.addf %81, %82 : vector<2x24xf32>
    %84 = vector.extract_strided_slice %80 {offsets = [0, 0], sizes = [2, 16], strides = [1, 1]} : vector<2x24xf32> to vector<2x16xf32>
    %85 = vector.extract_strided_slice %83 {offsets = [0, 0], sizes = [2, 16], strides = [1, 1]} : vector<2x24xf32> to vector<2x16xf32>
    %86 = arith.addf %84, %85 : vector<2x16xf32>
    %87 = arith.negf %86 : vector<2x16xf32>
    %88 = math.exp %87 : vector<2x16xf32>
    %cst_22 = arith.constant 1.000000e+00 : f32
    %89 = vector.broadcast %cst_22 : f32 to vector<2x16xf32>
    %90 = arith.addf %89, %88 : vector<2x16xf32>
    %91 = arith.divf %89, %90 : vector<2x16xf32>
    %92 = vector.extract_strided_slice %91 {offsets = [0, 0], sizes = [2, 8], strides = [1, 1]} : vector<2x16xf32> to vector<2x8xf32>
    %93 = vector.extract_strided_slice %91 {offsets = [0, 8], sizes = [2, 8], strides = [1, 1]} : vector<2x16xf32> to vector<2x8xf32>
    %94 = vector.extract_strided_slice %80 {offsets = [0, 16], sizes = [2, 8], strides = [1, 1]} : vector<2x24xf32> to vector<2x8xf32>
    %95 = vector.extract_strided_slice %83 {offsets = [0, 16], sizes = [2, 8], strides = [1, 1]} : vector<2x24xf32> to vector<2x8xf32>
    %96 = arith.mulf %92, %95 : vector<2x8xf32>
    %97 = arith.addf %94, %96 : vector<2x8xf32>
    %98 = math.tanh %97 : vector<2x8xf32>
    %99 = arith.subf %78, %98 : vector<2x8xf32>
    %100 = arith.mulf %93, %99 : vector<2x8xf32>
    %101 = arith.addf %98, %100 : vector<2x8xf32>
    %c6 = arith.constant 6 : index
    %c0_23 = arith.constant 0 : index
    %102 = vector.load %arg4[%c6, %c0_23] : memref<16x8xf32, #tpu.memory_space<vmem>>, vector<2x8xf32>
    tpu.vector_store %arg4[%c6, %c0_23], %101 {strides = array<i32>} : memref<16x8xf32, #tpu.memory_space<vmem>>, vector<2x8xf32>,
    %103 = vector.extract_strided_slice %9 {offsets = [8, 0], sizes = [2, 24], strides = [1, 1]} : vector<16x24xf32> to vector<2x24xf32>
    %cst_24 = arith.constant dense<0.000000e+00> : vector<2x24xf32>
    %104 = tpu.matmul %101, %1, %cst_24 {dimension_numbers = #tpu.dot_dimension_numbers<[1], [0], [0], [1], [0, 0, 1, 1], [], []>} : vector<2x8xf32>, vector<8x24xf32>, vector<2x24xf32> -> vector<2x24xf32>
    %105 = vector.broadcast %3 : vector<1x24xf32> to vector<2x24xf32>
    %106 = arith.addf %104, %105 : vector<2x24xf32>
    %107 = vector.extract_strided_slice %103 {offsets = [0, 0], sizes = [2, 16], strides = [1, 1]} : vector<2x24xf32> to vector<2x16xf32>
    %108 = vector.extract_strided_slice %106 {offsets = [0, 0], sizes = [2, 16], strides = [1, 1]} : vector<2x24xf32> to vector<2x16xf32>
    %109 = arith.addf %107, %108 : vector<2x16xf32>
    %110 = arith.negf %109 : vector<2x16xf32>
    %111 = math.exp %110 : vector<2x16xf32>
    %cst_25 = arith.constant 1.000000e+00 : f32
    %112 = vector.broadcast %cst_25 : f32 to vector<2x16xf32>
    %113 = arith.addf %112, %111 : vector<2x16xf32>
    %114 = arith.divf %112, %113 : vector<2x16xf32>
    %115 = vector.extract_strided_slice %114 {offsets = [0, 0], sizes = [2, 8], strides = [1, 1]} : vector<2x16xf32> to vector<2x8xf32>
    %116 = vector.extract_strided_slice %114 {offsets = [0, 8], sizes = [2, 8], strides = [1, 1]} : vector<2x16xf32> to vector<2x8xf32>
    %117 = vector.extract_strided_slice %103 {offsets = [0, 16], sizes = [2, 8], strides = [1, 1]} : vector<2x24xf32> to vector<2x8xf32>
    %118 = vector.extract_strided_slice %106 {offsets = [0, 16], sizes = [2, 8], strides = [1, 1]} : vector<2x24xf32> to vector<2x8xf32>
    %119 = arith.mulf %115, %118 : vector<2x8xf32>
    %120 = arith.addf %117, %119 : vector<2x8xf32>
    %121 = math.tanh %120 : vector<2x8xf32>
    %122 = arith.subf %101, %121 : vector<2x8xf32>
    %123 = arith.mulf %116, %122 : vector<2x8xf32>
    %124 = arith.addf %121, %123 : vector<2x8xf32>
    %c8 = arith.constant 8 : index
    %c0_26 = arith.constant 0 : index
    %125 = vector.load %arg4[%c8, %c0_26] : memref<16x8xf32, #tpu.memory_space<vmem>>, vector<2x8xf32>
    tpu.vector_store %arg4[%c8, %c0_26], %124 {strides = array<i32>} : memref<16x8xf32, #tpu.memory_space<vmem>>, vector<2x8xf32>,
    %126 = vector.extract_strided_slice %9 {offsets = [10, 0], sizes = [2, 24], strides = [1, 1]} : vector<16x24xf32> to vector<2x24xf32>
    %cst_27 = arith.constant dense<0.000000e+00> : vector<2x24xf32>
    %127 = tpu.matmul %124, %1, %cst_27 {dimension_numbers = #tpu.dot_dimension_numbers<[1], [0], [0], [1], [0, 0, 1, 1], [], []>} : vector<2x8xf32>, vector<8x24xf32>, vector<2x24xf32> -> vector<2x24xf32>
    %128 = vector.broadcast %3 : vector<1x24xf32> to vector<2x24xf32>
    %129 = arith.addf %127, %128 : vector<2x24xf32>
    %130 = vector.extract_strided_slice %126 {offsets = [0, 0], sizes = [2, 16], strides = [1, 1]} : vector<2x24xf32> to vector<2x16xf32>
    %131 = vector.extract_strided_slice %129 {offsets = [0, 0], sizes = [2, 16], strides = [1, 1]} : vector<2x24xf32> to vector<2x16xf32>
    %132 = arith.addf %130, %131 : vector<2x16xf32>
    %133 = arith.negf %132 : vector<2x16xf32>
    %134 = math.exp %133 : vector<2x16xf32>
    %cst_28 = arith.constant 1.000000e+00 : f32
    %135 = vector.broadcast %cst_28 : f32 to vector<2x16xf32>
    %136 = arith.addf %135, %134 : vector<2x16xf32>
    %137 = arith.divf %135, %136 : vector<2x16xf32>
    %138 = vector.extract_strided_slice %137 {offsets = [0, 0], sizes = [2, 8], strides = [1, 1]} : vector<2x16xf32> to vector<2x8xf32>
    %139 = vector.extract_strided_slice %137 {offsets = [0, 8], sizes = [2, 8], strides = [1, 1]} : vector<2x16xf32> to vector<2x8xf32>
    %140 = vector.extract_strided_slice %126 {offsets = [0, 16], sizes = [2, 8], strides = [1, 1]} : vector<2x24xf32> to vector<2x8xf32>
    %141 = vector.extract_strided_slice %129 {offsets = [0, 16], sizes = [2, 8], strides = [1, 1]} : vector<2x24xf32> to vector<2x8xf32>
    %142 = arith.mulf %138, %141 : vector<2x8xf32>
    %143 = arith.addf %140, %142 : vector<2x8xf32>
    %144 = math.tanh %143 : vector<2x8xf32>
    %145 = arith.subf %124, %144 : vector<2x8xf32>
    %146 = arith.mulf %139, %145 : vector<2x8xf32>
    %147 = arith.addf %144, %146 : vector<2x8xf32>
    %c10 = arith.constant 10 : index
    %c0_29 = arith.constant 0 : index
    %148 = vector.load %arg4[%c10, %c0_29] : memref<16x8xf32, #tpu.memory_space<vmem>>, vector<2x8xf32>
    tpu.vector_store %arg4[%c10, %c0_29], %147 {strides = array<i32>} : memref<16x8xf32, #tpu.memory_space<vmem>>, vector<2x8xf32>,
    %149 = vector.extract_strided_slice %9 {offsets = [12, 0], sizes = [2, 24], strides = [1, 1]} : vector<16x24xf32> to vector<2x24xf32>
    %cst_30 = arith.constant dense<0.000000e+00> : vector<2x24xf32>
    %150 = tpu.matmul %147, %1, %cst_30 {dimension_numbers = #tpu.dot_dimension_numbers<[1], [0], [0], [1], [0, 0, 1, 1], [], []>} : vector<2x8xf32>, vector<8x24xf32>, vector<2x24xf32> -> vector<2x24xf32>
    %151 = vector.broadcast %3 : vector<1x24xf32> to vector<2x24xf32>
    %152 = arith.addf %150, %151 : vector<2x24xf32>
    %153 = vector.extract_strided_slice %149 {offsets = [0, 0], sizes = [2, 16], strides = [1, 1]} : vector<2x24xf32> to vector<2x16xf32>
    %154 = vector.extract_strided_slice %152 {offsets = [0, 0], sizes = [2, 16], strides = [1, 1]} : vector<2x24xf32> to vector<2x16xf32>
    %155 = arith.addf %153, %154 : vector<2x16xf32>
    %156 = arith.negf %155 : vector<2x16xf32>
    %157 = math.exp %156 : vector<2x16xf32>
    %cst_31 = arith.constant 1.000000e+00 : f32
    %158 = vector.broadcast %cst_31 : f32 to vector<2x16xf32>
    %159 = arith.addf %158, %157 : vector<2x16xf32>
    %160 = arith.divf %158, %159 : vector<2x16xf32>
    %161 = vector.extract_strided_slice %160 {offsets = [0, 0], sizes = [2, 8], strides = [1, 1]} : vector<2x16xf32> to vector<2x8xf32>
    %162 = vector.extract_strided_slice %160 {offsets = [0, 8], sizes = [2, 8], strides = [1, 1]} : vector<2x16xf32> to vector<2x8xf32>
    %163 = vector.extract_strided_slice %149 {offsets = [0, 16], sizes = [2, 8], strides = [1, 1]} : vector<2x24xf32> to vector<2x8xf32>
    %164 = vector.extract_strided_slice %152 {offsets = [0, 16], sizes = [2, 8], strides = [1, 1]} : vector<2x24xf32> to vector<2x8xf32>
    %165 = arith.mulf %161, %164 : vector<2x8xf32>
    %166 = arith.addf %163, %165 : vector<2x8xf32>
    %167 = math.tanh %166 : vector<2x8xf32>
    %168 = arith.subf %147, %167 : vector<2x8xf32>
    %169 = arith.mulf %162, %168 : vector<2x8xf32>
    %170 = arith.addf %167, %169 : vector<2x8xf32>
    %c12_32 = arith.constant 12 : index
    %c0_33 = arith.constant 0 : index
    %171 = vector.load %arg4[%c12_32, %c0_33] : memref<16x8xf32, #tpu.memory_space<vmem>>, vector<2x8xf32>
    tpu.vector_store %arg4[%c12_32, %c0_33], %170 {strides = array<i32>} : memref<16x8xf32, #tpu.memory_space<vmem>>, vector<2x8xf32>,
    %172 = vector.extract_strided_slice %9 {offsets = [14, 0], sizes = [2, 24], strides = [1, 1]} : vector<16x24xf32> to vector<2x24xf32>
    %cst_34 = arith.constant dense<0.000000e+00> : vector<2x24xf32>
    %173 = tpu.matmul %170, %1, %cst_34 {dimension_numbers = #tpu.dot_dimension_numbers<[1], [0], [0], [1], [0, 0, 1, 1], [], []>} : vector<2x8xf32>, vector<8x24xf32>, vector<2x24xf32> -> vector<2x24xf32>
    %174 = vector.broadcast %3 : vector<1x24xf32> to vector<2x24xf32>
    %175 = arith.addf %173, %174 : vector<2x24xf32>
    %176 = vector.extract_strided_slice %172 {offsets = [0, 0], sizes = [2, 16], strides = [1, 1]} : vector<2x24xf32> to vector<2x16xf32>
    %177 = vector.extract_strided_slice %175 {offsets = [0, 0], sizes = [2, 16], strides = [1, 1]} : vector<2x24xf32> to vector<2x16xf32>
    %178 = arith.addf %176, %177 : vector<2x16xf32>
    %179 = arith.negf %178 : vector<2x16xf32>
    %180 = math.exp %179 : vector<2x16xf32>
    %cst_35 = arith.constant 1.000000e+00 : f32
    %181 = vector.broadcast %cst_35 : f32 to vector<2x16xf32>
    %182 = arith.addf %181, %180 : vector<2x16xf32>
    %183 = arith.divf %181, %182 : vector<2x16xf32>
    %184 = vector.extract_strided_slice %183 {offsets = [0, 0], sizes = [2, 8], strides = [1, 1]} : vector<2x16xf32> to vector<2x8xf32>
    %185 = vector.extract_strided_slice %183 {offsets = [0, 8], sizes = [2, 8], strides = [1, 1]} : vector<2x16xf32> to vector<2x8xf32>
    %186 = vector.extract_strided_slice %172 {offsets = [0, 16], sizes = [2, 8], strides = [1, 1]} : vector<2x24xf32> to vector<2x8xf32>
    %187 = vector.extract_strided_slice %175 {offsets = [0, 16], sizes = [2, 8], strides = [1, 1]} : vector<2x24xf32> to vector<2x8xf32>
    %188 = arith.mulf %184, %187 : vector<2x8xf32>
    %189 = arith.addf %186, %188 : vector<2x8xf32>
    %190 = math.tanh %189 : vector<2x8xf32>
    %191 = arith.subf %170, %190 : vector<2x8xf32>
    %192 = arith.mulf %185, %191 : vector<2x8xf32>
    %193 = arith.addf %190, %192 : vector<2x8xf32>
    %c14_36 = arith.constant 14 : index
    %c0_37 = arith.constant 0 : index
    %194 = vector.load %arg4[%c14_36, %c0_37] : memref<16x8xf32, #tpu.memory_space<vmem>>, vector<2x8xf32>
    tpu.vector_store %arg4[%c14_36, %c0_37], %193 {strides = array<i32>} : memref<16x8xf32, #tpu.memory_space<vmem>>, vector<2x8xf32>,
    %c0_38 = arith.constant 0 : index
    %c0_39 = arith.constant 0 : index
    %195 = vector.load %arg4[%c0_38, %c0_39] : memref<16x8xf32, #tpu.memory_space<vmem>>, vector<16x8xf32>
    %cst_40 = arith.constant dense<0.000000e+00> : vector<16x4xf32>
    %196 = tpu.matmul %195, %4, %cst_40 {dimension_numbers = #tpu.dot_dimension_numbers<[1], [0], [0], [1], [0, 0, 1, 1], [], []>} : vector<16x8xf32>, vector<8x4xf32>, vector<16x4xf32> -> vector<16x4xf32>
    %197 = vector.broadcast %5 : vector<1x4xf32> to vector<16x4xf32>
    %198 = arith.addf %196, %197 : vector<16x4xf32>
    %c0_41 = arith.constant 0 : index
    %c0_42 = arith.constant 0 : index
    %199 = vector.load %arg3[%c0_41, %c0_42] : memref<16x4xf32, #tpu.memory_space<vmem>>, vector<16x4xf32>
    tpu.vector_store %arg3[%c0_41, %c0_42], %198 {strides = array<i32>} : memref<16x4xf32, #tpu.memory_space<vmem>>, vector<16x4xf32>,
    return
  }
}

</mosaic_0001>

<bundles_post_ra>
// kernel: _forward_jit.1
= control target key start
LH: loop header
LB: loop body
LE: loop exit
PB: predicated region body
PF: predicated region fallthrough
CT: control target
= control target key end

     0   :  { %vm30_vm0 = vcmask 1043456   ;;  %vm23_vm1 = vcmask 31744   ;;  %vm59_vm2 = vcmask 64512   ;;  %s790_s21 = smov 112   ;;  %s791_s24 = smov 16   ;;  %vm133_vm7 = vcmask 58368   ;;  %s973_s2 = inlined_call_operand.vmem [shape: f32[23,24], index: 2, kind: input, shape index: {}]   ;;  %s974_s0 = inlined_call_operand.vmem [shape: f32[16,4], index: 0, kind: input, shape index: {}]   ;;  %s975_s1 = inlined_call_operand.vmem [shape: f32[2,8], index: 1, kind: input, shape index: {}]   ;;  %s976_s3 = inlined_call_operand.vmem [shape: f32[16,4], index: 3, kind: output, shape index: {}]  }
   0x1   :  { %v14_v0 = vld [vmem:[%s973_s2] sm:$0xf]  ;;  %v820_v1 = vld [vmem:[%s973_s2 + $0x4] sm:$0xff]  ;;  %v840_v4 = vld [vmem:[%s973_s2 + $0xd] ss:$0 sm:$0xff]  ;;  %s792_s25 = smov 8  }
   0x2   :  { %714 = vmatpush.msk.msra.mxu0 %vm30_vm0, %v14_v0  ;;  %v20_v2 = vld [vmem:[%s974_s0] sm:$0xff]  ;;  %78 = vmatpush.msra.mxu1 %v820_v1  ;;  %v847_v7 = vld [vmem:[%s973_s2 + $0xc] ss:$0 sm:$0xff]  ;;  %s793_s26 = smov 120  }
   0x3   :  { %v57_v3 = vld [vmem:[%s975_s1] sm:$0x3]  ;;  %715 = vmatmul.msk.f32.vlgmr.msra.gmra.mxu0 %vm23_vm1, %v20_v2  ;;  %152 = vmatpush.msra.mxu3 %v820_v1 }
   0x4   :  { %717 = vmatmul.msk.f32.vlgmr.msra.gmra.mxu1 %vm59_vm2, %v57_v3  ;;  %389 = vmatpush.msra.mxu2 %v820_v1 }
   0x5   :  { %231 = vmatpush.msrb.mxu3 %v820_v1  ;;  %310 = vmatpush.msrb.mxu1 %v820_v1 }
   0x6   :  { %540 = vmatpush.msrb.mxu0 %v820_v1 }
   0x7   :  { %618 = vmatpush.msra.mxu1 %v820_v1 }
  0x80   :  { %v51_v8 = vpop.f32.mrf.mxu0 }
  0x81   :  { %v80_v5 = vpop.f32.mrf.mxu1  ;;  %v850_v9 = vadd.f32 %v847_v7, %v51_v8 }
  0x82   :  { %v81_v6 = vadd.f32 %v840_v4, %v80_v5 }
  0x84   :  { %104 = vrot.lane.b32.xlu0 %v81_v6, %s790_s21  ;;  %v83_v10 = vadd.f32 %v81_v6, %v850_v9 }
  0x86   :  { %v718_v11 = vmul.f32 -1.442695, %v83_v10 }
  0x88   :  { %742 = vpow2.f32 %v718_v11 }
  0x8e   :  { %v743_v12 = vpop.eup %742 }
  0x8f   :  { %v87_v13 = vadd.f32 1.0, %v743_v12 }
  0x91   :  { %744 = vrcp.f32 %v87_v13  ;;  %v99_v19 = vand.u32 2147483648, %v87_v13  ;;  %vm93_vm4 = vweird.f32 %v87_v13  ;;  %v97_v20 = vand.u32 2147483647, %v87_v13 }
  0x93   :  { %v100_v22 = vor.u32 1.1754944e-38, %v99_v19  ;;  %vm98_vm6 = vcmp.eq.f32.partialorder %v97_v20, 8.507059e+37 }
  0x97   :  { %v745_v14 = vpop.eup %744 }
  0x98   :  { %v89_v15 = vmul.f32 %v745_v14, %v87_v13  ;;  %vm94_vm3 = vweird.f32 %v745_v14 }
  0x99   :  { %vm95_vm5 = vmor %vm93_vm4, %vm94_vm3 }
  0x9a   :  { %v90_v16 = vsub.f32 1.0, %v89_v15 }
  0x9c   :  { %v91_v17 = vmul.f32 %v745_v14, %v90_v16 }
  0x9e   :  { %v92_v18 = vadd.f32 %v745_v14, %v91_v17 }
  0xa0   :  { %v96_v21 = vsel %vm95_vm5, %v745_v14, %v92_v18 }
  0xa1   :  { %v101_v24 = vsel %vm98_vm6, %v100_v22, %v96_v21 }
  0xf6   :  { %v105_v23 = vpop.permute.xlu0 %104 }
  0xf7   :  { %v107_v25 = vmul.f32 %v105_v23, %v101_v24 }
  0xf9   :  { %109 = vrot.lane.b32.xlu0 %v107_v25, %s791_s24 }
 0x16b   :  { %v110_v26 = vpop.permute.xlu0 %109 }
 0x16c   :  { %v112_v27 = vadd.f32 %v110_v26, %v850_v9 }
 0x16e   :  { %746 = vtanh.f32 %v112_v27 }
 0x174   :  { %v747_v28 = vpop.eup %746 }
 0x175   :  { %115 = vrot.lane.b32.xlu1 %v747_v28, %s790_s21 }
 0x1e7   :  { %v116_v29 = vpop.permute.xlu1 %115 }
 0x1e8   :  { %v118_v30 = vsub.f32 %v57_v3, %v116_v29 }
 0x1ea   :  { %120 = vrot.lane.b32.xlu1 %v118_v30, %s792_s25 }
 0x25c   :  { %v121_v31 = vpop.permute.xlu1 %120 }
 0x25d   :  { %v123_v32 = vmul.f32 %v121_v31, %v101_v24 }
 0x25f   :  { %125 = vrot.lane.b32.xlu2 %v123_v32, %s792_s25 }
 0x2b9   :  { %v126_v33 = vpop.permute.xlu2 %125 }
 0x2ba   :  { %v128_v34 = vadd.f32 %v747_v28, %v126_v33 }
 0x2bc   :  { %130 = vrot.lane.b32.xlu2 %v128_v34, %s790_s21 }
 0x316   :  { %v131_v35 = vpop.permute.xlu2 %130 }
 0x317   :  { %134 = vst.msk [vmem:[#allocation2] sm:$0x3] %vm133_vm7, %v131_v35  ;;  %719 = vmatmul.msk.f32.vlgmr.msra.gmra.mxu3 %vm59_vm2, %v131_v35 }
 0x318   :  { %462 = vmatpush.msra.mxu3 %v820_v1 }
 0x39a   :  { %v154_v36 = vpop.f32.mrf.mxu3 }
 0x39b   :  { %v155_v37 = vadd.f32 %v840_v4, %v154_v36 }
 0x39d   :  { %v158_v38 = vrot.slane %v155_v37, 6 }
 0x39f   :  { %180 = vrot.lane.b32.xlu0 %v158_v38, %s790_s21  ;;  %v160_v39 = vadd.f32 %v158_v38, %v850_v9 }
 0x3a1   :  { %v720_v40 = vmul.f32 -1.442695, %v160_v39 }
 0x3a3   :  { %748 = vpow2.f32 %v720_v40 }
 0x3a9   :  { %v749_v41 = vpop.eup %748 }
 0x3aa   :  { %v164_v42 = vadd.f32 1.0, %v749_v41 }
 0x3ac   :  { %750 = vrcp.f32 %v164_v42  ;;  %v176_v48 = vand.u32 2147483648, %v164_v42  ;;  %vm170_vm9 = vweird.f32 %v164_v42  ;;  %v174_v49 = vand.u32 2147483647, %v164_v42 }
 0x3ae   :  { %v177_v51 = vor.u32 1.1754944e-38, %v176_v48  ;;  %vm175_vm11 = vcmp.eq.f32.partialorder %v174_v49, 8.507059e+37 }
 0x3b2   :  { %v751_v43 = vpop.eup %750 }
 0x3b3   :  { %v166_v44 = vmul.f32 %v751_v43, %v164_v42  ;;  %vm171_vm8 = vweird.f32 %v751_v43 }
 0x3b4   :  { %vm172_vm10 = vmor %vm170_vm9, %vm171_vm8 }
 0x3b5   :  { %v167_v45 = vsub.f32 1.0, %v166_v44 }
 0x3b7   :  { %v168_v46 = vmul.f32 %v751_v43, %v167_v45 }
 0x3b9   :  { %v169_v47 = vadd.f32 %v751_v43, %v168_v46 }
 0x3bb   :  { %v173_v50 = vsel %vm172_vm10, %v751_v43, %v169_v47 }
 0x3bc   :  { %v178_v53 = vsel %vm175_vm11, %v177_v51, %v173_v50 }
 0x411   :  { %v181_v52 = vpop.permute.xlu0 %180 }
 0x412   :  { %v183_v54 = vmul.f32 %v181_v52, %v178_v53 }
 0x414   :  { %185 = vrot.lane.b32.xlu1 %v183_v54, %s791_s24 }
 0x486   :  { %v186_v55 = vpop.permute.xlu1 %185 }
 0x487   :  { %v188_v56 = vadd.f32 %v186_v55, %v850_v9 }
 0x489   :  { %752 = vtanh.f32 %v188_v56 }
 0x48f   :  { %v753_v57 = vpop.eup %752 }
 0x490   :  { %v191_v58 = vrot.slane %v753_v57, 2 }
 0x492   :  { %v193_v59 = vsub.f32 %v128_v34, %v191_v58 }
 0x494   :  { %v195_v60 = vrot.slane %v193_v59, 6 }
 0x496   :  { %196 = vrot.lane.b32.xlu2 %v195_v60, %s793_s26 }
 0x4f0   :  { %v197_v61 = vpop.permute.xlu2 %196 }
 0x4f1   :  { %v199_v62 = vmul.f32 %v197_v61, %v178_v53 }
 0x4f3   :  { %201 = vrot.lane.b32.xlu0 %v199_v62, %s792_s25 }
 0x565   :  { %v202_v63 = vpop.permute.xlu0 %201 }
 0x566   :  { %v869_v0 = vadd.f32 %v753_v57, %v202_v63 }
 0x568   :  { %v211_v1 = vrot.slane %v869_v0, 2 }
 0x56a   :  { %212 = vrot.lane.b32.xlu1 %v211_v1, %s790_s21 }
 0x5dc   :  { %v213_v2 = vpop.permute.xlu1 %212 }
 0x5dd   :  { %721 = vmatmul.msk.f32.vlgmr.msrb.gmra.mxu3 %vm59_vm2, %v213_v2 }
 0x660   :  { %v233_v3 = vpop.f32.mrf.mxu3 }
 0x661   :  { %v234_v5 = vadd.f32 %v840_v4, %v233_v3 }
 0x663   :  { %v237_v6 = vrot.slane %v234_v5, 4 }
 0x665   :  { %259 = vrot.lane.b32.xlu2 %v237_v6, %s790_s21  ;;  %v239_v8 = vadd.f32 %v237_v6, %v850_v9 }
 0x667   :  { %v722_v10 = vmul.f32 -1.442695, %v239_v8 }
 0x669   :  { %754 = vpow2.f32 %v722_v10 }
 0x66f   :  { %v755_v11 = vpop.eup %754 }
 0x670   :  { %v243_v12 = vadd.f32 1.0, %v755_v11 }
 0x672   :  { %756 = vrcp.f32 %v243_v12  ;;  %v255_v18 = vand.u32 2147483648, %v243_v12  ;;  %vm249_vm13 = vweird.f32 %v243_v12  ;;  %v253_v19 = vand.u32 2147483647, %v243_v12 }
 0x674   :  { %v256_v21 = vor.u32 1.1754944e-38, %v255_v18  ;;  %vm254_vm15 = vcmp.eq.f32.partialorder %v253_v19, 8.507059e+37 }
 0x678   :  { %v757_v13 = vpop.eup %756 }
 0x679   :  { %v245_v14 = vmul.f32 %v757_v13, %v243_v12  ;;  %vm250_vm12 = vweird.f32 %v757_v13 }
 0x67a   :  { %vm251_vm14 = vmor %vm249_vm13, %vm250_vm12 }
 0x67b   :  { %v246_v15 = vsub.f32 1.0, %v245_v14 }
 0x67d   :  { %v247_v16 = vmul.f32 %v757_v13, %v246_v15 }
 0x67f   :  { %v248_v17 = vadd.f32 %v757_v13, %v247_v16 }
 0x681   :  { %v252_v20 = vsel %vm251_vm14, %v757_v13, %v248_v17 }
 0x682   :  { %v257_v23 = vsel %vm254_vm15, %v256_v21, %v252_v20 }
 0x6bf   :  { %v260_v22 = vpop.permute.xlu2 %259 }
 0x6c0   :  { %v262_v24 = vmul.f32 %v260_v22, %v257_v23 }
 0x6c2   :  { %264 = vrot.lane.b32.xlu0 %v262_v24, %s791_s24 }
 0x734   :  { %v265_v25 = vpop.permute.xlu0 %264 }
 0x735   :  { %v267_v26 = vadd.f32 %v265_v25, %v850_v9 }
 0x737   :  { %758 = vtanh.f32 %v267_v26 }
 0x73d   :  { %v759_v27 = vpop.eup %758 }
 0x73e   :  { %v270_v28 = vrot.slane %v759_v27, 2 }
 0x740   :  { %v272_v29 = vsub.f32 %v869_v0, %v270_v28 }
 0x742   :  { %v274_v30 = vrot.slane %v272_v29, 6 }
 0x744   :  { %275 = vrot.lane.b32.xlu1 %v274_v30, %s793_s26 }
 0x7b6   :  { %v276_v31 = vpop.permute.xlu1 %275 }
 0x7b7   :  { %v278_v32 = vmul.f32 %v276_v31, %v257_v23 }
 0x7b9   :  { %280 = vrot.lane.b32.xlu2 %v278_v32, %s792_s25 }
 0x813   :  { %v281_v33 = vpop.permute.xlu2 %280 }
 0x814   :  { %v882_v34 = vadd.f32 %v759_v27, %v281_v33 }
 0x816   :  { %v290_v35 = vrot.slane %v882_v34, 4 }
 0x818   :  { %291 = vrot.lane.b32.xlu0 %v290_v35, %s790_s21 }
 0x88a   :  { %v292_v36 = vpop.permute.xlu0 %291 }
 0x88b   :  { %723 = vmatmul.msk.f32.vlgmr.msrb.gmra.mxu1 %vm59_vm2, %v292_v36 }
 0x908   :  { %v312_v37 = vpop.f32.mrf.mxu1 }
 0x909   :  { %v313_v38 = vadd.f32 %v840_v4, %v312_v37 }
 0x90b   :  { %v316_v39 = vrot.slane %v313_v38, 2 }
 0x90d   :  { %338 = vrot.lane.b32.xlu1 %v316_v39, %s790_s21  ;;  %v318_v40 = vadd.f32 %v316_v39, %v850_v9 }
 0x90f   :  { %v724_v41 = vmul.f32 -1.442695, %v318_v40 }
 0x911   :  { %760 = vpow2.f32 %v724_v41 }
 0x917   :  { %v761_v42 = vpop.eup %760 }
 0x918   :  { %v322_v43 = vadd.f32 1.0, %v761_v42 }
 0x91a   :  { %762 = vrcp.f32 %v322_v43  ;;  %v334_v49 = vand.u32 2147483648, %v322_v43  ;;  %vm328_vm3 = vweird.f32 %v322_v43  ;;  %v332_v50 = vand.u32 2147483647, %v322_v43 }
 0x91c   :  { %v335_v52 = vor.u32 1.1754944e-38, %v334_v49  ;;  %vm333_vm5 = vcmp.eq.f32.partialorder %v332_v50, 8.507059e+37 }
 0x920   :  { %v763_v44 = vpop.eup %762 }
 0x921   :  { %v324_v45 = vmul.f32 %v763_v44, %v322_v43  ;;  %vm329_vm0 = vweird.f32 %v763_v44 }
 0x922   :  { %vm330_vm4 = vmor %vm328_vm3, %vm329_vm0 }
 0x923   :  { %v325_v46 = vsub.f32 1.0, %v324_v45 }
 0x925   :  { %v326_v47 = vmul.f32 %v763_v44, %v325_v46 }
 0x927   :  { %v327_v48 = vadd.f32 %v763_v44, %v326_v47 }
 0x929   :  { %v331_v51 = vsel %vm330_vm4, %v763_v44, %v327_v48 }
 0x92a   :  { %v336_v54 = vsel %vm333_vm5, %v335_v52, %v331_v51 }
 0x97f   :  { %v339_v53 = vpop.permute.xlu1 %338 }
 0x980   :  { %v341_v55 = vmul.f32 %v339_v53, %v336_v54 }
 0x982   :  { %343 = vrot.lane.b32.xlu2 %v341_v55, %s791_s24 }
 0x9dc   :  { %v344_v56 = vpop.permute.xlu2 %343 }
 0x9dd   :  { %v346_v57 = vadd.f32 %v344_v56, %v850_v9  ;;  %v21_v9 = vld [vmem:[%s974_s0 + $0x8] sm:$0xff] }
 0x9de   :  { %716 = vmatmul.msk.f32.gmra.mxu0 %vm23_vm1, %v21_v9 }
 0x9df   :  { %764 = vtanh.f32 %v346_v57 }
 0x9e5   :  { %v765_v58 = vpop.eup %764 }
 0x9e6   :  { %v349_v59 = vrot.slane %v765_v58, 2 }
 0x9e8   :  { %v351_v60 = vsub.f32 %v882_v34, %v349_v59 }
 0x9ea   :  { %v353_v61 = vrot.slane %v351_v60, 6 }
 0x9ec   :  { %354 = vrot.lane.b32.xlu0 %v353_v61, %s793_s26 }
 0xa5b   :  { %v54_v10 = vpop.f32.mrf.mxu0 }
 0xa5c   :  { %v907_v11 = vadd.f32 %v847_v7, %v54_v10 }
 0xa5e   :  { %v355_v62 = vpop.permute.xlu0 %354 }
 0xa5f   :  { %v357_v63 = vmul.f32 %v355_v62, %v336_v54 }
 0xa61   :  { %359 = vrot.lane.b32.xlu1 %v357_v63, %s792_s25 }
 0xad3   :  { %v360_v1 = vpop.permute.xlu1 %359 }
 0xad4   :  { %v895_v2 = vadd.f32 %v765_v58, %v360_v1 }
 0xad6   :  { %v369_v3 = vrot.slane %v895_v2, 6 }
 0xad8   :  { %370 = vrot.lane.b32.xlu2 %v369_v3, %s790_s21 }
 0xb32   :  { %v371_v5 = vpop.permute.xlu2 %370 }
 0xb33   :  { %725 = vmatmul.msk.f32.vlgmr.msra.gmra.mxu2 %vm59_vm2, %v371_v5 }
 0xbb6   :  { %v391_v6 = vpop.f32.mrf.mxu2 }
 0xbb7   :  { %v392_v8 = vadd.f32 %v840_v4, %v391_v6 }
 0xbb9   :  { %415 = vrot.lane.b32.xlu0 %v392_v8, %s790_s21  ;;  %v394_v12 = vadd.f32 %v392_v8, %v907_v11 }
 0xbbb   :  { %v726_v13 = vmul.f32 -1.442695, %v394_v12 }
 0xbbd   :  { %766 = vpow2.f32 %v726_v13 }
 0xbc3   :  { %v767_v14 = vpop.eup %766 }
 0xbc4   :  { %v398_v15 = vadd.f32 1.0, %v767_v14 }
 0xbc6   :  { %768 = vrcp.f32 %v398_v15  ;;  %v410_v21 = vand.u32 2147483648, %v398_v15  ;;  %vm404_vm8 = vweird.f32 %v398_v15  ;;  %v408_v22 = vand.u32 2147483647, %v398_v15 }
 0xbc8   :  { %v411_v7 = vor.u32 1.1754944e-38, %v410_v21  ;;  %vm409_vm10 = vcmp.eq.f32.partialorder %v408_v22, 8.507059e+37 }
 0xbcc   :  { %v769_v16 = vpop.eup %768 }
 0xbcd   :  { %v400_v17 = vmul.f32 %v769_v16, %v398_v15  ;;  %vm405_vm6 = vweird.f32 %v769_v16 }
 0xbce   :  { %vm406_vm9 = vmor %vm404_vm8, %vm405_vm6 }
 0xbcf   :  { %v401_v18 = vsub.f32 1.0, %v400_v17 }
 0xbd1   :  { %v402_v19 = vmul.f32 %v769_v16, %v401_v18 }
 0xbd3   :  { %v403_v20 = vadd.f32 %v769_v16, %v402_v19 }
 0xbd5   :  { %v407_v23 = vsel %vm406_vm9, %v769_v16, %v403_v20  ;;  %vm209_vm9 = vcmask 60418  }
 0xbd6   :  { %v412_v25 = vsel %vm409_vm10, %v411_v7, %v407_v23  ;;  %vm288_vm10 = vcmask 62468  }
 0xc2b   :  { %v416_v24 = vpop.permute.xlu0 %415 }
 0xc2c   :  { %v418_v26 = vmul.f32 %v416_v24, %v412_v25 }
 0xc2e   :  { %420 = vrot.lane.b32.xlu1 %v418_v26, %s791_s24 }
 0xca0   :  { %v421_v27 = vpop.permute.xlu1 %420 }
 0xca1   :  { %v423_v28 = vadd.f32 %v421_v27, %v907_v11 }
 0xca3   :  { %770 = vtanh.f32 %v423_v28 }
 0xca9   :  { %v771_v29 = vpop.eup %770 }
 0xcaa   :  { %v426_v30 = vrot.slane %v771_v29, 2 }
 0xcac   :  { %v428_v31 = vsub.f32 %v895_v2, %v426_v30 }
 0xcae   :  { %v430_v32 = vrot.slane %v428_v31, 6 }
 0xcb0   :  { %431 = vrot.lane.b32.xlu2 %v430_v32, %s793_s26 }
 0xd0a   :  { %v432_v33 = vpop.permute.xlu2 %431 }
 0xd0b   :  { %v434_v35 = vmul.f32 %v432_v33, %v412_v25 }
 0xd0d   :  { %436 = vrot.lane.b32.xlu0 %v434_v35, %s792_s25 }
 0xd7f   :  { %v437_v36 = vpop.permute.xlu0 %436 }
 0xd80   :  { %v439_v37 = vadd.f32 %v771_v29, %v437_v36 }
 0xd82   :  { %441 = vrot.lane.b32.xlu1 %v439_v37, %s790_s21 }
 0xdf4   :  { %v442_v38 = vpop.permute.xlu1 %441 }
 0xdf5   :  { %444 = vst.msk [vmem:[#allocation2 + $0x8] sm:$0x3] %vm133_vm7, %v442_v38  ;;  %727 = vmatmul.msk.f32.vlgmr.msra.gmra.mxu3 %vm59_vm2, %v442_v38 }
 0xe78   :  { %v464_v39 = vpop.f32.mrf.mxu3 }
 0xe79   :  { %v465_v40 = vadd.f32 %v840_v4, %v464_v39 }
 0xe7b   :  { %v468_v41 = vrot.slane %v465_v40, 6 }
 0xe7d   :  { %490 = vrot.lane.b32.xlu2 %v468_v41, %s790_s21  ;;  %v470_v42 = vadd.f32 %v468_v41, %v907_v11 }
 0xe7f   :  { %v728_v43 = vmul.f32 -1.442695, %v470_v42 }
 0xe81   :  { %772 = vpow2.f32 %v728_v43 }
 0xe87   :  { %v773_v44 = vpop.eup %772 }
 0xe88   :  { %v474_v45 = vadd.f32 1.0, %v773_v44 }
 0xe8a   :  { %774 = vrcp.f32 %v474_v45  ;;  %v486_v51 = vand.u32 2147483648, %v474_v45  ;;  %vm480_vm11 = vweird.f32 %v474_v45  ;;  %v484_v52 = vand.u32 2147483647, %v474_v45 }
 0xe8c   :  { %v487_v54 = vor.u32 1.1754944e-38, %v486_v51  ;;  %vm485_vm13 = vcmp.eq.f32.partialorder %v484_v52, 8.507059e+37 }
 0xe90   :  { %v775_v46 = vpop.eup %774 }
 0xe91   :  { %v476_v47 = vmul.f32 %v775_v46, %v474_v45  ;;  %vm481_vm7 = vweird.f32 %v775_v46 }
 0xe92   :  { %vm482_vm12 = vmor %vm480_vm11, %vm481_vm7  ;;  %vm367_vm7 = vcmask 64518  }
 0xe93   :  { %v477_v48 = vsub.f32 1.0, %v476_v47 }
 0xe95   :  { %v478_v49 = vmul.f32 %v775_v46, %v477_v48 }
 0xe97   :  { %v479_v50 = vadd.f32 %v775_v46, %v478_v49 }
 0xe99   :  { %v483_v53 = vsel %vm482_vm12, %v775_v46, %v479_v50 }
 0xe9a   :  { %v488_v56 = vsel %vm485_vm13, %v487_v54, %v483_v53 }
 0xed7   :  { %v491_v55 = vpop.permute.xlu2 %490 }
 0xed8   :  { %v493_v57 = vmul.f32 %v491_v55, %v488_v56 }
 0xeda   :  { %495 = vrot.lane.b32.xlu0 %v493_v57, %s791_s24 }
 0xf4c   :  { %v496_v58 = vpop.permute.xlu0 %495 }
 0xf4d   :  { %v498_v59 = vadd.f32 %v496_v58, %v907_v11 }
 0xf4f   :  { %776 = vtanh.f32 %v498_v59 }
 0xf55   :  { %v777_v60 = vpop.eup %776 }
 0xf56   :  { %v501_v61 = vrot.slane %v777_v60, 2 }
 0xf58   :  { %v503_v62 = vsub.f32 %v439_v37, %v501_v61 }
 0xf5a   :  { %v505_v63 = vrot.slane %v503_v62, 6 }
 0xf5c   :  { %506 = vrot.lane.b32.xlu1 %v505_v63, %s793_s26 }
 0xfce   :  { %v507_v1 = vpop.permute.xlu1 %506 }
 0xfcf   :  { %v509_v3 = vmul.f32 %v507_v1, %v488_v56 }
 0xfd1   :  { %511 = vrot.lane.b32.xlu2 %v509_v3, %s792_s25 }
0x102b   :  { %v512_v9 = vpop.permute.xlu2 %511 }
0x102c   :  { %v925_v5 = vadd.f32 %v777_v60, %v512_v9 }
0x102e   :  { %v520_v6 = vrot.slane %v925_v5, 2 }
0x1030   :  { %521 = vrot.lane.b32.xlu0 %v520_v6, %s790_s21 }
0x10a2   :  { %v522_v8 = vpop.permute.xlu0 %521 }
0x10a3   :  { %729 = vmatmul.msk.f32.vlgmr.msrb.gmra.mxu0 %vm59_vm2, %v522_v8 }
0x1120   :  { %v542_v10 = vpop.f32.mrf.mxu0 }
0x1121   :  { %v543_v12 = vadd.f32 %v840_v4, %v542_v10  ;;  %v18_v10 = vld [vmem:[%s973_s2 + $0xe] sm:$0xff] }
0x1122   :  { %700 = vmatpush.msrb.mxu2 %v18_v10 }
0x1123   :  { %v546_v13 = vrot.slane %v543_v12, 4 }
0x1125   :  { %568 = vrot.lane.b32.xlu1 %v546_v13, %s790_s21  ;;  %v548_v14 = vadd.f32 %v546_v13, %v907_v11 }
0x1127   :  { %v730_v15 = vmul.f32 -1.442695, %v548_v14 }
0x1129   :  { %778 = vpow2.f32 %v730_v15 }
0x112f   :  { %v779_v16 = vpop.eup %778 }
0x1130   :  { %v552_v17 = vadd.f32 1.0, %v779_v16  ;;  %v741_v16 = vld [vmem:[%s973_s2 + $0x16] ss:$0 sm:$0xff] }
0x1132   :  { %780 = vrcp.f32 %v552_v17  ;;  %v564_v23 = vand.u32 2147483648, %v552_v17  ;;  %vm558_vm15 = vweird.f32 %v552_v17  ;;  %v562_v7 = vand.u32 2147483647, %v552_v17 }
0x1134   :  { %v565_v25 = vor.u32 1.1754944e-38, %v564_v23  ;;  %vm563_vm3 = vcmp.eq.f32.partialorder %v562_v7, 8.507059e+37 }
0x1138   :  { %v781_v18 = vpop.eup %780 }
0x1139   :  { %v554_v19 = vmul.f32 %v781_v18, %v552_v17  ;;  %vm559_vm14 = vweird.f32 %v781_v18 }
0x113a   :  { %vm560_vm0 = vmor %vm558_vm15, %vm559_vm14 }
0x113b   :  { %v555_v20 = vsub.f32 1.0, %v554_v19 }
0x113d   :  { %v556_v21 = vmul.f32 %v781_v18, %v555_v20 }
0x113f   :  { %v557_v22 = vadd.f32 %v781_v18, %v556_v21 }
0x1141   :  { %v561_v24 = vsel %vm560_vm0, %v781_v18, %v557_v22 }
0x1142   :  { %v566_v27 = vsel %vm563_vm3, %v565_v25, %v561_v24 }
0x1197   :  { %v569_v26 = vpop.permute.xlu1 %568 }
0x1198   :  { %v571_v28 = vmul.f32 %v569_v26, %v566_v27 }
0x119a   :  { %573 = vrot.lane.b32.xlu2 %v571_v28, %s791_s24 }
0x11f4   :  { %v574_v29 = vpop.permute.xlu2 %573 }
0x11f5   :  { %v576_v30 = vadd.f32 %v574_v29, %v907_v11 }
0x11f7   :  { %782 = vtanh.f32 %v576_v30 }
0x11fd   :  { %v783_v31 = vpop.eup %782 }
0x11fe   :  { %v579_v32 = vrot.slane %v783_v31, 2 }
0x1200   :  { %v581_v33 = vsub.f32 %v925_v5, %v579_v32 }
0x1202   :  { %v583_v35 = vrot.slane %v581_v33, 6 }
0x1204   :  { %584 = vrot.lane.b32.xlu0 %v583_v35, %s793_s26 }
0x1276   :  { %v585_v36 = vpop.permute.xlu0 %584 }
0x1277   :  { %v587_v37 = vmul.f32 %v585_v36, %v566_v27 }
0x1279   :  { %589 = vrot.lane.b32.xlu1 %v587_v37, %s792_s25 }
0x12eb   :  { %v590_v38 = vpop.permute.xlu1 %589 }
0x12ec   :  { %v592_v39 = vadd.f32 %v783_v31, %v590_v38 }
0x12ee   :  { %v598_v40 = vrot.slane %v592_v39, 4 }
0x12f0   :  { %599 = vrot.lane.b32.xlu2 %v598_v40, %s790_s21 }
0x134a   :  { %v600_v41 = vpop.permute.xlu2 %599 }
0x134b   :  { %731 = vmatmul.msk.f32.vlgmr.msra.gmra.mxu1 %vm59_vm2, %v600_v41 }
0x13c8   :  { %v620_v42 = vpop.f32.mrf.mxu1 }
0x13c9   :  { %v621_v43 = vadd.f32 %v840_v4, %v620_v42 }
0x13cb   :  { %v624_v44 = vrot.slane %v621_v43, 2 }
0x13cd   :  { %646 = vrot.lane.b32.xlu0 %v624_v44, %s790_s21  ;;  %v626_v45 = vadd.f32 %v624_v44, %v907_v11 }
0x13cf   :  { %v732_v46 = vmul.f32 -1.442695, %v626_v45 }
0x13d1   :  { %784 = vpow2.f32 %v732_v46 }
0x13d7   :  { %v785_v47 = vpop.eup %784 }
0x13d8   :  { %v630_v48 = vadd.f32 1.0, %v785_v47 }
0x13da   :  { %786 = vrcp.f32 %v630_v48  ;;  %v642_v54 = vand.u32 2147483648, %v630_v48  ;;  %vm636_vm5 = vweird.f32 %v630_v48  ;;  %v640_v55 = vand.u32 2147483647, %v630_v48 }
0x13dc   :  { %v643_v56 = vor.u32 1.1754944e-38, %v642_v54  ;;  %vm641_vm8 = vcmp.eq.f32.partialorder %v640_v55, 8.507059e+37 }
0x13e0   :  { %v787_v49 = vpop.eup %786 }
0x13e1   :  { %v632_v50 = vmul.f32 %v787_v49, %v630_v48  ;;  %vm637_vm4 = vweird.f32 %v787_v49 }
0x13e2   :  { %vm638_vm6 = vmor %vm636_vm5, %vm637_vm4 }
0x13e3   :  { %v633_v51 = vsub.f32 1.0, %v632_v50 }
0x13e5   :  { %v634_v52 = vmul.f32 %v787_v49, %v633_v51 }
0x13e7   :  { %v635_v53 = vadd.f32 %v787_v49, %v634_v52 }
0x13e9   :  { %v639_v4 = vsel %vm638_vm6, %v787_v49, %v635_v53 }
0x13ea   :  { %v644_v58 = vsel %vm641_vm8, %v643_v56, %v639_v4 }
0x143f   :  { %v647_v57 = vpop.permute.xlu0 %646 }
0x1440   :  { %v649_v59 = vmul.f32 %v647_v57, %v644_v58 }
0x1442   :  { %651 = vrot.lane.b32.xlu1 %v649_v59, %s791_s24 }
0x144a   :  { %206 = vrot.lane.b32.xlu1 %v869_v0, %s790_s21 }
0x1452   :  { %516 = vrot.lane.b32.xlu1 %v925_v5, %s790_s21 }
0x14b4   :  { %v652_v60 = vpop.permute.xlu1 %651 }
0x14b5   :  { %v654_v61 = vadd.f32 %v652_v60, %v907_v11 }
0x14b7   :  { %788 = vtanh.f32 %v654_v61 }
0x14bc   :  { %v207_v62 = vpop.permute.xlu1 %206 }
0x14bd   :  { %v789_v63 = vpop.eup %788  ;;  %210 = vst.msk [vmem:[#allocation2] sm:$0xc] %vm209_vm9, %v207_v62 }
0x14be   :  { %v657_v1 = vrot.slane %v789_v63, 2 }
0x14c0   :  { %v659_v3 = vsub.f32 %v592_v39, %v657_v1 }
0x14c2   :  { %v661_v9 = vrot.slane %v659_v3, 6 }
0x14c4   :  { %662 = vrot.lane.b32.xlu2 %v661_v9, %s793_s26  ;;  %v517_v6 = vpop.permute.xlu1 %516 }
0x14c5   :  { %519 = vst.msk [vmem:[#allocation2 + $0x8] sm:$0xc] %vm209_vm9, %v517_v6 }
0x14cc   :  { %285 = vrot.lane.b32.xlu2 %v882_v34, %s790_s21 }
0x14d4   :  { %594 = vrot.lane.b32.xlu2 %v592_v39, %s790_s21 }
0x151e   :  { %v663_v0 = vpop.permute.xlu2 %662 }
0x151f   :  { %v665_v5 = vmul.f32 %v663_v0, %v644_v58 }
0x1521   :  { %667 = vrot.lane.b32.xlu0 %v665_v5, %s792_s25 }
0x1526   :  { %v286_v11 = vpop.permute.xlu2 %285 }
0x1527   :  { %289 = vst.msk [vmem:[#allocation2] sm:$0x30] %vm288_vm10, %v286_v11 }
0x1529   :  { %364 = vrot.lane.b32.xlu0 %v895_v2, %s790_s21 }
0x152e   :  { %v595_v8 = vpop.permute.xlu2 %594 }
0x152f   :  { %597 = vst.msk [vmem:[#allocation2 + $0x8] sm:$0x30] %vm288_vm10, %v595_v8 }
0x1593   :  { %v668_v34 = vpop.permute.xlu0 %667 }
0x1594   :  { %v670_v12 = vadd.f32 %v789_v63, %v668_v34 }
0x1596   :  { %672 = vrot.lane.b32.xlu0 %v670_v12, %s790_s21 }
0x159b   :  { %v365_v13 = vpop.permute.xlu0 %364 }
0x159c   :  { %368 = vst.msk [vmem:[#allocation2] sm:$0xc0] %vm367_vm7, %v365_v13 }
0x15a3   :  { %v676_v14 = vld [vmem:[#allocation2] sm:$0xff] }
0x15a4   :  { %733 = vmatmul.msk.f32.vlgmr.msrb.gmra.mxu2 %vm59_vm2, %v676_v14 }
0x1608   :  { %v673_v15 = vpop.permute.xlu0 %672 }
0x1609   :  { %675 = vst.msk [vmem:[#allocation2 + $0x8] sm:$0xc0] %vm367_vm7, %v673_v15 }
0x1610   :  { %v677_v2 = vld [vmem:[#allocation2 + $0x8] sm:$0xff] }
0x1611   :  { %734 = vmatmul.msk.f32.gmra.mxu2 %vm59_vm2, %v677_v2 }
0x1627   :  { %v702_v17 = vpop.f32.mrf.mxu2 }
0x1628   :  { %v703_v18 = vadd.f32 %v741_v16, %v702_v17 }
0x162a   :  { %708 = vst.msk [vmem:[%s976_s3] sm:$0xff] %vm23_vm1, %v703_v18 }
0x1694   :  { %v705_v19 = vpop.f32.mrf.mxu2 }
0x1695   :  { %v706_v20 = vadd.f32 %v741_v16, %v705_v19 }
0x1697   :  { %709 = vst.msk [vmem:[%s976_s3 + $0x8] sm:$0xff] %vm23_vm1, %v706_v20 }

</bundles_post_ra>
